<compile_context>
chip_gen: v6e
topology: v6e:2x2x1
jax: 0.10.0
libtpu: 0.0.40
codegen_flags: <defaults>
</compile_context>

<pallas_src>
import functools
import numpy as np

import jax
import jax.numpy as jnp
from jax.experimental import pallas as pl
from jax.experimental.pallas import tpu as pltpu

MAX_TILE = 4096  # lane tile cap (radii axis); footprint stays << scoped VMEM


# ----------------------------------------------------------------------------
# NumPy helpers (host-side parameter setup, mirrors RadialBasis.__init__)
# ----------------------------------------------------------------------------
def _trapezoid(y, x):
    """Version-proof trapezoid rule (np.trapz was removed in NumPy 2.x)."""
    y = np.asarray(y, dtype=np.float64)
    x = np.asarray(x, dtype=np.float64)
    return float(np.sum(0.5 * (y[1:] + y[:-1]) * np.diff(x)))


def _np_sph_j(l, x):
    """Spherical Bessel function of the first kind j_l via upward recurrence."""
    x = np.asarray(x, dtype=np.float64)
    safe = np.where(x == 0.0, 1.0, x)
    s, c = np.sin(safe), np.cos(safe)
    j0 = np.where(x == 0.0, 1.0, s / safe)
    if l == 0:
        return j0
    j1 = np.where(x == 0.0, 0.0, s / safe**2 - c / safe)
    jm1, jc = j0, j1
    for ll in range(1, l):
        jn = (2 * ll + 1) / safe * jc - jm1
        jn = np.where(x == 0.0, 0.0, jn)
        jm1, jc = jc, jn
    return jc


def _np_sph_y(l, x):
    """Spherical Bessel function of the second kind y_l via upward recurrence."""
    x = np.asarray(x, dtype=np.float64)
    safe = np.where(x == 0.0, 1.0, x)
    s, c = np.sin(safe), np.cos(safe)
    y0 = -c / safe
    if l == 0:
        return y0
    y1 = -c / safe**2 - s / safe
    ym1, yc = y0, y1
    for ll in range(1, l):
        yn = (2 * ll + 1) / safe * yc - ym1
        ym1, yc = yc, yn
    return yc


def get_spherical_bessel_zeros(n_big, l_max):
    """First n_big positive zeros of j_l for l = 0..l_max. Shape [n_big, l_max+1]."""
    n_need = n_big + l_max
    z = np.zeros((l_max + 1, n_need), dtype=np.float64)
    z[0] = np.arange(1, n_need + 1) * np.pi
    for l in range(1, l_max + 1):
        for k in range(n_need - l):
            lo, hi = z[l - 1, k], z[l - 1, k + 1]
            flo = _np_sph_j(l, np.array([lo]))[0]
            for _ in range(100):  # bisection (zeros of j_l interlace zeros of j_{l-1})
                mid = 0.5 * (lo + hi)
                fm = _np_sph_j(l, np.array([mid]))[0]
                if flo * fm <= 0.0:
                    hi = mid
                else:
                    lo, flo = mid, fm
            z[l, k] = 0.5 * (lo + hi)
    return z.T[:n_big]  # [n, l]


def get_LE_normalization_factors(kind, a, n_big, l_max, zeros):
    """1 / sqrt( int_0^a f_l(z_{nl} r / a)^2 r^2 dr ).  Shape [n_big, l_max+1]."""
    eps = 1e-6 * a if kind == "second" else 0.0  # second kind diverges at r=0
    rr = np.linspace(eps, a, 20001)
    norms = np.zeros((n_big, l_max + 1), dtype=np.float64)
    fn = _np_sph_j if kind == "first" else _np_sph_y
    for l in range(l_max + 1):
        for n in range(n_big):
            f = fn(l, zeros[n, l] * rr / a)
            integral = _trapezoid(f * f * rr * rr, rr)
            norms[n, l] = 1.0 / np.sqrt(integral)
    return norms


# ----------------------------------------------------------------------------
# Pallas kernel (hot path): fused spherical-Bessel evaluation for all (l, n)
# ----------------------------------------------------------------------------
def _radial_kernel(r_ref, params_ref, out_ref, *, kind, l_top, guard_zero,
                   approx_recip):
    # r_ref:      (1, TILE)      radii along lanes
    # params_ref: (R_pad, 3)     col0 = zeros[n,l_eff]/a, col1 = l_eff, col2 = norm
    # out_ref:    (R_pad, TILE)  packed, lane-dense output
    r = r_ref[...]                          # (1, T)
    params = params_ref[...]                # (R, 3) tiny, resident
    scale = params[:, 0:1]                  # (R, 1)
    order = params[:, 1:2]                  # (R, 1)  l_eff as float
    norm = params[:, 2:3]                   # (R, 1)  0 on padded rows

    x = scale * r                           # broadcast -> (R, T)

    if guard_zero:
        # Single compare + single select here; one more select after the
        # recurrence.  NOTE: exact compare — tiny-but-nonzero r is not guarded.
        zero = r == 0.0                     # (1, T), broadcasts into (R, T) uses
        safe = jnp.where(zero, 1.0, x)
    else:
        safe = x

    # Hoisted reciprocal; every "/x" below becomes a multiply.  approx=True
    # would keep the refinement off the saturated VALU slot, but its error is
    # amplified through the recurrence — exact by default (review fallback).
    inv = pl.reciprocal(safe, approx=True) if approx_recip else 1.0 / safe
    s = jnp.sin(safe)
    c = jnp.cos(safe)

    # l = 0
    f0 = s * inv if kind == "first" else -c * inv
    acc = jnp.where(order == 0.0, f0, 0.0)

    if l_top >= 1:
        # l = 1
        f1 = (f0 - c) * inv if kind == "first" else (f0 - s) * inv
        acc = jnp.where(order == 1.0, f1, acc)
        # l = 2..l_top : fused accumulate, only the last two f arrays live.
        f_prev, f_cur = f0, f1
        for ll in range(1, l_top):
            f_next = (2.0 * ll + 1.0) * inv * f_cur - f_prev
            acc = jnp.where(order == float(ll + 1), f_next, acc)
            f_prev, f_cur = f_cur, f_next

    if guard_zero:
        # j_0(0) = 1, j_l(0) = 0 for l >= 1; intermediates stayed finite (safe=1).
        acc = jnp.where(zero, jnp.where(order == 0.0, 1.0, 0.0), acc)

    out_ref[...] = acc * norm


def _choose_lane_tiling(n_pts, max_tile=MAX_TILE):
    """Pick (tile, n_pad): tile multiple of 128, <= max_tile, and >= 2 grid
    steps so the 'parallel' axis can shard across both TensorCores on v7x."""
    n128 = max(pl.cdiv(n_pts, 128), 1) * 128
    tile = min(max_tile, max(128, (n128 // 2 // 128) * 128))
    n_pad = max(2 * tile, pl.cdiv(n_pts, tile) * tile)
    return tile, n_pad


def radial_basis_forward(r, *, zeros, norm_factors, a, n_max, l_max, mode, kind,
                         max_tile=MAX_TILE, approx_recip=False, as_slab=False):
    """Pallas implementation of RadialBasis.forward. r: 1-D array of radii.

    as_slab=True returns (slab (rows_pad, n_pad), row_bounds, rows, n_pts) so a
    downstream consumer can skip the transpose / column-split HBM pass.
    """
    assert r.ndim == 1
    n_pts = r.shape[0]
    tile, n_pad = _choose_lane_tiling(n_pts, max_tile)

    # Pad lanes with r = a (strictly positive) so padded lanes are benign.
    r_pad = (
        jnp.full((1, n_pad), float(a), jnp.float32)
        .at[0, :n_pts]
        .set(r.astype(jnp.float32))
    )

    l_top = 0 if mode == "single bessel" else l_max
    rows = int(sum(n_max[l] for l in range(l_max + 1)))
    r_rows_pad = max(8, ((rows + 7) // 8) * 8)  # full 8-sublane output tiles

    # Per-row params: scale, order (l_eff), norm.  Padded rows: scale=1 (finite
    # x), order=0, norm=0 (zero output).
    params_np = np.zeros((r_rows_pad, 3), dtype=np.float32)
    params_np[:, 0] = 1.0
    row_bounds = []
    row = 0
    for l in range(l_max + 1):
        l_eff = 0 if mode == "single bessel" else l
        n_l = n_max[l]
        params_np[row:row + n_l, 0] = zeros[:n_l, l_eff] / a
        params_np[row:row + n_l, 1] = float(l_eff)
        params_np[row:row + n_l, 2] = norm_factors[:n_l, l]
        row_bounds.append((row, row + n_l))
        row += n_l

    out = pl.pallas_call(
        functools.partial(
            _radial_kernel, kind=kind, l_top=l_top,
            guard_zero=(kind == "first"), approx_recip=approx_recip,
        ),
        out_shape=jax.ShapeDtypeStruct((r_rows_pad, n_pad), jnp.float32),
        grid=(n_pad // tile,),
        in_specs=[
            pl.BlockSpec((1, tile), lambda i: (0, i)),
            pl.BlockSpec((r_rows_pad, 3), lambda i: (0, 0)),
        ],
        out_specs=pl.BlockSpec((r_rows_pad, tile), lambda i: (0, i)),
        compiler_params=pltpu.CompilerParams(dimension_semantics=("parallel",)),
    )(r_pad, jnp.asarray(params_np))

    if as_slab:
        return out, row_bounds, rows, n_pts

    # One transpose of the fused slab, then cheap per-l column splits
    # (matches torch.stack(l_block, dim=-1) per l).  Keep out of the kernel:
    # in-kernel transpose would force sub-128-lane masked stores.
    full = out[:rows, :n_pts].T  # (N, sum(n_max))
    return [full[:, s:e] for (s, e) in row_bounds]


# ----------------------------------------------------------------------------
# Main
# ----------------------------------------------------------------------------
if __name__ == "__main__":
    hypers = {
        "l_max": 3,
        "n_max": [5, 4, 3, 2],
        "cutoff radius": 4.0,
        "mode": "full bessel",   # anything != 'single bessel' -> l_eff = l
        "kind": "first",
    }
    l_max = hypers["l_max"]
    n_max = hypers["n_max"]
    a = hypers["cutoff radius"]
    mode = hypers["mode"]
    kind = hypers["kind"]

    # Deterministic parameter setup (mirrors RadialBasis.__init__)
    zeros = get_spherical_bessel_zeros(max(n_max), l_max)            # [n, l]
    norm_factors = get_LE_normalization_factors(kind, a, max(n_max), l_max, zeros)

    # Deterministic small input: 16 radii in (0, a)
    key = jax.random.PRNGKey(0)
    r = jax.random.uniform(key, (16,), dtype=jnp.float32, minval=0.05 * a, maxval=a)

    outputs = radial_basis_forward(
        r, zeros=zeros, norm_factors=norm_factors, a=a,
        n_max=n_max, l_max=l_max, mode=mode, kind=kind,
    )
    outputs = [jax.block_until_ready(o) for o in outputs]

    # Pure-NumPy reference check of the forward semantics
    r_np = np.asarray(r, dtype=np.float64)
    fn_np = _np_sph_j if kind == "first" else _np_sph_y
    ok = True
    for l in range(l_max + 1):
        l_eff = 0 if mode == "single bessel" else l
        ref_cols = []
        for n in range(n_max[l]):
            ref_cols.append(
                norm_factors[n, l] * fn_np(l_eff, zeros[n, l_eff] * r_np / a)
            )
        ref = np.stack(ref_cols, axis=-1)
        got = np.asarray(outputs[l])
        if got.shape != (r.shape[0], n_max[l]):
            ok = False
        if not np.allclose(got, ref, rtol=2e-4, atol=2e-5):
            ok = False

    if ok:
        print("KERNEL_OK")
    else:
        print("MISMATCH")
</pallas_src>

<mosaic_0001>
module attributes {stable_mosaic.version = 11 : i64} {
  func.func @_radial_kernel(%arg0: i32, %arg1: memref<1x128xf32, #tpu.memory_space<vmem>>, %arg2: memref<16x3xf32, #tpu.memory_space<vmem>>, %arg3: memref<16x128xf32, #tpu.memory_space<vmem>>) attributes {dimension_semantics = [#tpu.dimension_semantics<parallel>], iteration_bounds = array<i64: 2>, scalar_prefetch = 0 : i64, scratch_operands = 0 : i64, tpu.core_type = #tpu.core_type<tc>, window_params = [{transform_indices = @transform_0, window_bounds = array<i64: 1, 128>}, {pipeline_mode = #tpu.pipeline_mode<synchronous>, transform_indices = @transform_1, window_bounds = array<i64: 16, 3>}, {transform_indices = @transform_2, window_bounds = array<i64: 16, 128>}]} {
    %c0 = arith.constant 0 : index
    %c0_0 = arith.constant 0 : index
    %0 = vector.load %arg1[%c0, %c0_0] : memref<1x128xf32, #tpu.memory_space<vmem>>, vector<1x128xf32>
    %c0_1 = arith.constant 0 : index
    %c0_2 = arith.constant 0 : index
    %1 = vector.load %arg2[%c0_1, %c0_2] : memref<16x3xf32, #tpu.memory_space<vmem>>, vector<16x3xf32>
    %2 = vector.extract_strided_slice %1 {offsets = [0, 0], sizes = [16, 1], strides = [1, 1]} : vector<16x3xf32> to vector<16x1xf32>
    %3 = vector.extract_strided_slice %1 {offsets = [0, 1], sizes = [16, 1], strides = [1, 1]} : vector<16x3xf32> to vector<16x1xf32>
    %4 = vector.extract_strided_slice %1 {offsets = [0, 2], sizes = [16, 1], strides = [1, 1]} : vector<16x3xf32> to vector<16x1xf32>
    %5 = vector.broadcast %2 : vector<16x1xf32> to vector<16x128xf32>
    %6 = vector.broadcast %0 : vector<1x128xf32> to vector<16x128xf32>
    %7 = arith.mulf %5, %6 : vector<16x128xf32>
    %cst = arith.constant 0.000000e+00 : f32
    %8 = vector.broadcast %cst : f32 to vector<1x128xf32>
    %9 = arith.cmpf oeq, %0, %8 : vector<1x128xf32>
    %cst_3 = arith.constant 1.000000e+00 : f32
    %10 = vector.shape_cast %9 : vector<1x128xi1> to vector<1x128xi1>
    %11 = vector.broadcast %10 : vector<1x128xi1> to vector<16x128xi1>
    %12 = vector.broadcast %cst_3 : f32 to vector<16x128xf32>
    %13 = arith.select %11, %12, %7 : vector<16x128xi1>, vector<16x128xf32>
    %cst_4 = arith.constant 1.000000e+00 : f32
    %14 = vector.broadcast %cst_4 : f32 to vector<16x128xf32>
    %15 = arith.divf %14, %13 : vector<16x128xf32>
    %16 = math.sin %13 : vector<16x128xf32>
    %17 = math.cos %13 : vector<16x128xf32>
    %18 = arith.mulf %16, %15 : vector<16x128xf32>
    %cst_5 = arith.constant 0.000000e+00 : f32
    %19 = vector.broadcast %cst_5 : f32 to vector<16x1xf32>
    %20 = arith.cmpf oeq, %3, %19 : vector<16x1xf32>
    %cst_6 = arith.constant 0.000000e+00 : f32
    %21 = vector.shape_cast %20 : vector<16x1xi1> to vector<16x1xi1>
    %22 = vector.broadcast %21 : vector<16x1xi1> to vector<16x128xi1>
    %23 = vector.broadcast %cst_6 : f32 to vector<16x128xf32>
    %24 = arith.select %22, %18, %23 : vector<16x128xi1>, vector<16x128xf32>
    %25 = arith.subf %18, %17 : vector<16x128xf32>
    %26 = arith.mulf %25, %15 : vector<16x128xf32>
    %cst_7 = arith.constant 1.000000e+00 : f32
    %27 = vector.broadcast %cst_7 : f32 to vector<16x1xf32>
    %28 = arith.cmpf oeq, %3, %27 : vector<16x1xf32>
    %29 = vector.shape_cast %28 : vector<16x1xi1> to vector<16x1xi1>
    %30 = vector.broadcast %29 : vector<16x1xi1> to vector<16x128xi1>
    %31 = arith.select %30, %26, %24 : vector<16x128xi1>, vector<16x128xf32>
    %cst_8 = arith.constant 3.000000e+00 : f32
    %32 = vector.broadcast %cst_8 : f32 to vector<16x128xf32>
    %33 = arith.mulf %32, %15 : vector<16x128xf32>
    %34 = arith.mulf %33, %26 : vector<16x128xf32>
    %35 = arith.subf %34, %18 : vector<16x128xf32>
    %cst_9 = arith.constant 2.000000e+00 : f32
    %36 = vector.broadcast %cst_9 : f32 to vector<16x1xf32>
    %37 = arith.cmpf oeq, %3, %36 : vector<16x1xf32>
    %38 = vector.shape_cast %37 : vector<16x1xi1> to vector<16x1xi1>
    %39 = vector.broadcast %38 : vector<16x1xi1> to vector<16x128xi1>
    %40 = arith.select %39, %35, %31 : vector<16x128xi1>, vector<16x128xf32>
    %cst_10 = arith.constant 5.000000e+00 : f32
    %41 = vector.broadcast %cst_10 : f32 to vector<16x128xf32>
    %42 = arith.mulf %41, %15 : vector<16x128xf32>
    %43 = arith.mulf %42, %35 : vector<16x128xf32>
    %44 = arith.subf %43, %26 : vector<16x128xf32>
    %cst_11 = arith.constant 3.000000e+00 : f32
    %45 = vector.broadcast %cst_11 : f32 to vector<16x1xf32>
    %46 = arith.cmpf oeq, %3, %45 : vector<16x1xf32>
    %47 = vector.shape_cast %46 : vector<16x1xi1> to vector<16x1xi1>
    %48 = vector.broadcast %47 : vector<16x1xi1> to vector<16x128xi1>
    %49 = arith.select %48, %44, %40 : vector<16x128xi1>, vector<16x128xf32>
    %cst_12 = arith.constant 0.000000e+00 : f32
    %50 = vector.broadcast %cst_12 : f32 to vector<16x1xf32>
    %51 = arith.cmpf oeq, %3, %50 : vector<16x1xf32>
    %cst_13 = arith.constant 1.000000e+00 : f32
    %cst_14 = arith.constant 0.000000e+00 : f32
    %52 = vector.broadcast %cst_13 : f32 to vector<16x1xf32>
    %53 = vector.broadcast %cst_14 : f32 to vector<16x1xf32>
    %54 = arith.select %51, %52, %53 : vector<16x1xi1>, vector<16x1xf32>
    %55 = vector.shape_cast %9 : vector<1x128xi1> to vector<1x128xi1>
    %56 = vector.broadcast %55 : vector<1x128xi1> to vector<16x128xi1>
    %57 = vector.shape_cast %54 : vector<16x1xf32> to vector<16x1xf32>
    %58 = vector.broadcast %57 : vector<16x1xf32> to vector<16x128xf32>
    %59 = arith.select %56, %58, %49 : vector<16x128xi1>, vector<16x128xf32>
    %60 = vector.broadcast %4 : vector<16x1xf32> to vector<16x128xf32>
    %61 = arith.mulf %59, %60 : vector<16x128xf32>
    %c0_15 = arith.constant 0 : index
    %c0_16 = arith.constant 0 : index
    %62 = vector.load %arg3[%c0_15, %c0_16] : memref<16x128xf32, #tpu.memory_space<vmem>>, vector<16x128xf32>
    tpu.vector_store %arg3[%c0_15, %c0_16], %61 {strides = array<i32>} : memref<16x128xf32, #tpu.memory_space<vmem>>, vector<16x128xf32>,
    return
  }
  func.func @transform_0(%arg0: i32) -> (i32, i32) {
    %c0_i32 = arith.constant 0 : i32
    %c0_i32_0 = arith.constant 0 : i32
    return %c0_i32, %arg0 : i32, i32
  }
  func.func @transform_1(%arg0: i32) -> (i32, i32) {
    %c0_i32 = arith.constant 0 : i32
    %c0_i32_0 = arith.constant 0 : i32
    %c0_i32_1 = arith.constant 0 : i32
    return %c0_i32, %c0_i32_0 : i32, i32
  }
  func.func @transform_2(%arg0: i32) -> (i32, i32) {
    %c0_i32 = arith.constant 0 : i32
    %c0_i32_0 = arith.constant 0 : i32
    return %c0_i32, %arg0 : i32, i32
  }
}

</mosaic_0001>

<bundles_post_ra>
// kernel: tpu_custom_call.1
= control target key start
LH: loop header
LB: loop body
LE: loop exit
PB: predicated region body
PF: predicated region fallthrough
CT: control target
= control target key end

     0   :  { %7 = vsyncpa [#allocation3], 0  ;;  %s1156_s0 = inlined_call_operand.vmem [shape: f32[1,256], index: 0, kind: input, shape index: {}]   ;;  %s1157_s1 = inlined_call_operand.vmem [shape: f32[16,3], index: 1, kind: input, shape index: {}]   ;;  %s1158_s2 = inlined_call_operand.hbm [shape: f32[16,256], index: 2, kind: output, shape index: {}]  }
   0x1   :  { %9 = vsyncpa [#allocation3 + $0x1], 0  ;;  %s954_s9 = smov 0   ;;  %s956_s10 = smov 0  }
   0x2   :  { %s958_s11 = smov 0   ;;  %s960_s12 = smov 0  }
   0x3 LB: > { %s975_s13 = sadd.s32 4294967295, %s923_s12   ;;  %s756_s14 = sadd.s32 4294967294, %s923_s12   ;;  %s923_s12 = sphi %s960_s12, %s1164_s12   ;;  %s919_s11 = sphi %s958_s11, %s1163_s11   ;;  %s915_s10 = sphi %s956_s10, %s1162_s10   ;;  %s911_s9 = sphi %s954_s9, %s1161_s9  }
   0x4   : > { %s979_s15 = sadd.s32 1, %s923_s12   ;;  %s69_s16 = sadd.s32 1, %s919_s11 }
   0x5   : > { %s66_s17 = ssub.s32 %s923_s12, %s979_s15  ;;  %p79_p0 = scmp.ne.s32.totalorder %s919_s11, %s915_s10 }
   0x6   : > { %p67_p1 = scmp.eq.s32.totalorder %s66_s17, 0  ;;  %p80_p2 = scmp.eq.s32.totalorder %s975_s13, 1 }
   0x7   : > { %p85_p3 = scmp.ne.s32.totalorder %s915_s10, %s911_s9  ;;  %p86_p4 = scmp.eq.s32.totalorder %s756_s14, 1 }
   0x8   : > { %s990_s18 = scalar_select %p67_p1, %s919_s11, %s69_s16  }
   0x9   : > { %p992_p5 = por %p80_p2, %p79_p0  ;;  %p996_p6 = por %p86_p4, %p85_p3 }
   0xa   : > { %p759_p7 = scmp.ge.s32.totalorder %s923_s12, 1  ;;  %p113_p8 = scmp.lt.s32.totalorder %s923_s12, 3 }
   0xc   : > { %p114_p9 = pnand %p759_p7, %p113_p8 }
   0xd   : > { %p133_p10 = scmp.lt.s32.totalorder (!%p114_p9), %s975_s13, 1  ;;  %s130_s29 = sand.u32 (!%p114_p9), 1, %s915_s10  }
   0xe   : > { %117 = sbr.rel (%p114_p9) target bundleno = 274 (0x112), region = 28  ;;  %s760_s30 = sshll.u32 (!%p114_p9), %s130_s29, 4 }
   0xf   : > { %s132_s3 = scalar_lea.vmem (!%p114_p9), [#allocation2], %s760_s30  ;;  %s778_s5 = sshll.u32 (!%p114_p9), %s975_s13, 7 }
  0x10   : > { %s697_s4 = sshll.u32 (!%p114_p9), %s132_s3, 4  ;;  %s1112_s8 = scalar_lea.hbm (!%p114_p9), %s1158_s2, %s778_s5  ;;  %s1105_s4 = int_to_ptr.vmem [resolvable:$true] %s697_s4 }
  0x11   : > { %s863_s14 = scalar_lea.vmem (!%p114_p9), %s1105_s4, 256  ;;  %s935_s16 = smov (!%p114_p9), [#allocation2]  }
  0x12   : > { %p864_p11 = scmp.ne.s32.totalorder (!%p114_p9), %s1105_s4, %s863_s14  ;;  %s867_s17 = sshll.u32 (!%p114_p9), %s935_s16, 4  ;;  %s868_s17 = int_to_ptr.vmem [resolvable:$false] %s867_s17 }
  0x13   : > { %v137_v0 = vld [vmem:[%s1157_s1] sm:$0xff]  ;;  %v138_v1 = vld [vmem:[%s1157_s1 + $0x8] sm:$0xff]  ;;  %v925_v2 = vmov 0   ;;  %v926_v3 = vmov 1   ;;  %v927_v10 = vmov 0.0   ;;  %v928_v16 = vmov 2   ;;  %p870_p0 = scmp.lt.s32.totalorder %s1105_s4, %s868_s17 }
  0x14   : > { %841 = vset.pattern.permute.xlu0 %v925_v2  ;;  %842 = vset.pattern.permute.xlu1 %v926_v3  ;;  %vm586_vm0 = vcmp.eq.f32.partialorder %v137_v0, 0.0  ;;  %vm587_vm1 = vcmp.eq.f32.partialorder %v138_v1, 0.0  ;;  %vm605_vm2 = vcmp.eq.f32.partialorder %v138_v1, 1.0  ;;  %vm604_vm3 = vcmp.eq.f32.partialorder %v137_v0, 1.0  ;;  %s134_s25 = scalar_select %p133_p10, %s975_s13, 1 }
  0x15   : > { %141 = vperm.xlu0 %841, %v137_v0   ;;  %v588_v4 = vsel %vm586_vm0, 1, %v925_v2  ;;  %v589_v5 = vsel %vm587_vm1, 1, %v925_v2  ;;  %v607_v6 = vsel %vm605_vm2, 1, %v925_v2  ;;  %v606_v7 = vsel %vm604_vm3, 1, %v925_v2  ;;  %s1116_s13 = scalar_lea.sflag [#allocation3], %s130_s29  ;;  %p865_p12 = pnand %p864_p11, %p992_p5 }
  0x16   : > { %591 = vperm.xlu1 %842, %v588_v4   ;;  %vm624_vm4 = vcmp.eq.f32.partialorder %v137_v0, 2.0  ;;  %vm625_vm5 = vcmp.eq.f32.partialorder %v138_v1, 2.0  ;;  %vm644_vm6 = vcmp.eq.f32.partialorder %v137_v0, 3.0  ;;  %vm645_vm7 = vcmp.eq.f32.partialorder %v138_v1, 3.0  ;;  %s135_s28 = scalar_lea.vmem %s1156_s0, %s134_s25  ;;  %s869_s21 = scalar_lea.vmem %s868_s17, 512 }
  0x17   : > { %v626_v8 = vsel %vm624_vm4, 1, %v925_v2  ;;  %v627_v9 = vsel %vm625_vm5, 1, %v925_v2  ;;  %v658_v11 = vsel %vm586_vm0, 1.0, %v927_v10  ;;  %v659_v12 = vsel %vm587_vm1, 1.0, %v927_v10  ;;  %v136_v18 = vld [vmem:[%s135_s28] sm:$0x1]  ;;  %p866_p13 = pneg %p865_p12  ;;  %p871_p1 = scmp.lt.s32.totalorder %s869_s21, %s863_s14 }
  0x18   : > { %v646_v13 = vsel %vm644_vm6, 1, %v925_v2  ;;  %v647_v14 = vsel %vm645_vm7, 1, %v925_v2  ;;  %v844_v15 = vpack.i.bf16 %v659_v12, %v658_v11  ;;  %v150_v17 = vlaneseq }
  0x19   : > { %146 = vperm.xlu0 %841, %v138_v1   ;;  %vm157_vm8 = vcmp.eq.f32.partialorder %v136_v18, 0.0  ;;  %v929_v46 = vmov 683565275   ;;  %v930_v50 = vmov 2475754826   ;;  %p872_p2 = por %p871_p1, %p870_p0 }
  0x1a   : > { %594 = vperm.xlu1 %842, %v589_v5   ;;  %v151_v19 = vshrl.u32 %v150_v17, 7  ;;  %v158_v21 = vsel %vm157_vm8, 1, %v925_v2  ;;  %v931_v52 = vmov 2131351028   ;;  %v932_v54 = vmov 2102212464  }
  0x1b   : > { %v933_v56 = vmov 920167782   ;;  %v934_v63 = vmov 1326507024   ;;  %p873_p3 = pnand %p872_p2, %p866_p13 }
  0x1c   : > { %v152_v20 = vsub.s32 0, %v151_v19 }
  0x1d   : > { %843 = vset.pattern.permute.xlu0 %v926_v3 }
  0x1e   : > { %612 = vperm.xlu1 %842, %v607_v6   ;;  %609 = vperm.xlu0 %843, %v606_v7   ;;  %v1017_v22 = vrot.slane %v158_v21, %v152_v20  ;;  %v153_v23 = vrot.slane %v136_v18, %v152_v20 }
  0x20   : > { %vm163_vm9 = vcmp.eq.s32.totalorder %v1017_v22, 1 }
  0x22   : > { %629 = vperm.xlu1 %842, %v626_v8   ;;  %632 = vperm.xlu0 %843, %v627_v9  }
  0x26   : > { %649 = vperm.xlu1 %842, %v646_v13   ;;  %652 = vperm.xlu0 %843, %v647_v14  }
  0x2a   : > { %845 = vperm.xlu1 %842, %v844_v15   ;;  %849 = vset.pattern.permute.xlu0 %v928_v16 }
  0x2b   : > { %673 = vperm.xlu0 %849, %v137_v0  }
  0x2e   : > { %850 = vset.pattern.permute.xlu1 %v928_v16 }
  0x2f   : > { %677 = vperm.xlu1 %850, %v138_v1  }
  0x90   : > { %v142_v24 = vpop.permute.xlu0 %141 }
  0x91   : > { %v155_v25 = vmul.f32 %v153_v23, %v142_v24 }
  0x93   : > { %v1022_v26 = vsel %vm163_vm9, 1.0, %v155_v25 }
  0x94   : > { %v170_v27 = vand.u32 2147483647, %v1022_v26  ;;  %v173_v28 = vand.u32 2139095040, %v1022_v26  ;;  %v147_v29 = vpop.permute.xlu0 %146  ;;  %vm172_vm8 = vcmp.lt.s32.totalorder %v1022_v26, 0 }
  0x95   : > { %v156_v30 = vmul.f32 %v153_v23, %v147_v29 }
  0x96   : > { %v174_v31 = vshrl.u32 %v173_v28, 23  ;;  %v177_v32 = vand.u32 8388607, %v170_v27 }
  0x97   : > { %v1030_v33 = vsel %vm163_vm9, 1.0, %v156_v30 }
  0x98   : > { %v761_v34 = vadd.s32 4294967169, %v174_v31  ;;  %v277_v35 = vand.u32 2139095040, %v1030_v33  ;;  %v178_v37 = vor.u32 8388608, %v177_v32  ;;  %v274_v39 = vand.u32 2147483647, %v1030_v33 }
  0x9a   : > { %v180_v36 = vadd.s32 1, %v761_v34  ;;  %v278_v38 = vshrl.u32 %v277_v35, 23  ;;  %v1034_v44 = vshll.u32 %v178_v37, 8  ;;  %v281_v48 = vand.u32 8388607, %v274_v39 }
  0x9c   : > { %vm181_vm10 = vcmp.gt.s32.totalorder %v180_v36, 0  ;;  %v765_v41 = vadd.s32 4294967169, %v278_v38  ;;  %v282_v14 = vor.u32 8388608, %v281_v48 }
  0x9d   : > { %v182_v40 = vsel %vm181_vm10, %v180_v36, 0  ;;  %vm171_vm10 = vcmp.le.f32.partialorder %v170_v27, 0.7853982 }
  0x9e   : > { %v183_v42 = vshrl.u32 %v182_v40, 5  ;;  %v184_v43 = vand.u32 31, %v182_v40  ;;  %v284_v49 = vadd.s32 1, %v765_v41  ;;  %v322_v30 = vshll.u32 %v282_v14, 8 }
  0xa0   : > { %v185_v45 = vsub.s32 32, %v184_v43  ;;  %v187_v47 = vshll.u32 %v929_v46, %v184_v43  ;;  %v190_v51 = vshll.u32 %v930_v50, %v184_v43  ;;  %v193_v53 = vshll.u32 %v931_v52, %v184_v43 }
  0xa1   : > { %v196_v55 = vshll.u32 %v932_v54, %v184_v43  ;;  %v199_v57 = vshll.u32 %v933_v56, %v184_v43  ;;  %vm202_vm11 = vcmp.lt.s32.totalorder %v183_v42, 1  ;;  %vm204_vm12 = vcmp.lt.s32.totalorder %v183_v42, 3 }
  0xa2   : > { %v188_v58 = vshrl.u32 %v930_v50, %v185_v45  ;;  %v191_v59 = vshrl.u32 %v931_v52, %v185_v45  ;;  %v194_v60 = vshrl.u32 %v932_v54, %v185_v45  ;;  %v186_v61 = vshrl.u32 %v929_v46, %v185_v45 }
  0xa3   : > { %v197_v62 = vshrl.u32 %v933_v56, %v185_v45  ;;  %v200_v0 = vshrl.u32 %v934_v63, %v185_v45  ;;  %vm285_vm13 = vcmp.gt.s32.totalorder %v284_v49, 0  ;;  %vm205_vm14 = vcmp.lt.s32.totalorder %v183_v42, 4 }
  0xa4   : > { %v189_v1 = vor.u32 %v188_v58, %v187_v47  ;;  %v192_v2 = vor.u32 %v191_v59, %v190_v51  ;;  %v195_v3 = vor.u32 %v194_v60, %v193_v53  ;;  %v286_v6 = vsel %vm285_vm13, %v284_v49, 0 }
  0xa5   : > { %v198_v4 = vor.u32 %v197_v62, %v196_v55  ;;  %v201_v5 = vor.u32 %v200_v0, %v199_v57  ;;  %vm203_vm15 = vcmp.lt.s32.totalorder %v183_v42, 2  ;;  %v288_v17 = vand.u32 31, %v286_v6 }
  0xa6   : > { %v206_v7 = vsel %vm202_vm11, %v186_v61, %v189_v1  ;;  %v207_v8 = vsel %vm205_vm14, %v195_v3, 2102212464  ;;  %v210_v9 = vsel %vm202_vm11, %v189_v1, %v192_v2  ;;  %v214_v10 = vsel %vm202_vm11, %v192_v2, %v195_v3 }
  0xa7   : > { %v208_v11 = vsel %vm204_vm12, %v192_v2, %v207_v8  ;;  %v211_v12 = vsel %vm205_vm14, %v198_v4, 920167782  ;;  %v215_v13 = vsel %vm205_vm14, %v201_v5, 1326507024  ;;  %v287_v28 = vshrl.u32 %v286_v6, 5 }
  0xa8   : > { %v212_v15 = vsel %vm204_vm12, %v195_v3, %v211_v12  ;;  %v216_v16 = vsel %vm204_vm12, %v198_v4, %v215_v13  ;;  %v209_v18 = vsel %vm203_vm15, %v206_v7, %v208_v11  ;;  %v289_v29 = vsub.s32 32, %v288_v17 }
  0xa9   : > { %v213_v19 = vsel %vm203_vm15, %v210_v9, %v212_v15  ;;  %v217_v20 = vsel %vm203_vm15, %v214_v10, %v216_v16  ;;  %v225_v31 = vmul.u32 %v1034_v44, %v209_v18  ;;  %v291_v32 = vshll.u32 %v929_v46, %v288_v17 }
  0xaa   : > { %v1047_v21 = vmul.u32.u64.low %v1034_v44, %v217_v20  ;;  %v1048_v23 = vmul.u32.u64.high %v1034_v44, %v217_v20, %v1047_v21  ;;  %v1051_v24 = vmul.u32.u64.low %v1034_v44, %v213_v19  ;;  %v1052_v25 = vmul.u32.u64.high %v1034_v44, %v213_v19, %v1051_v24 }
  0xab   : > { %v294_v34 = vshll.u32 %v930_v50, %v288_v17  ;;  %v297_v35 = vshll.u32 %v931_v52, %v288_v17  ;;  %v292_v36 = vshrl.u32 %v930_v50, %v289_v29  ;;  %v295_v37 = vshrl.u32 %v931_v52, %v289_v29 }
  0xac   : > { %v298_v38 = vshrl.u32 %v932_v54, %v289_v29  ;;  %v300_v40 = vshll.u32 %v932_v54, %v288_v17  ;;  %vm227_vm0 = vc.u32 %v1048_v23, %v1051_v24  ;;  %v228_v41 = vadd.s32 1, %v1052_v25 }
  0xad   : > { %v301_v42 = vshrl.u32 %v933_v56, %v289_v29  ;;  %v303_v43 = vshll.u32 %v933_v56, %v288_v17  ;;  %v293_v45 = vor.u32 %v292_v36, %v291_v32  ;;  %v296_v47 = vor.u32 %v295_v37, %v294_v34 }
  0xae   : > { %v299_v48 = vor.u32 %v298_v38, %v297_v35  ;;  %v304_v49 = vshrl.u32 %v934_v63, %v289_v29  ;;  %v229_v44 = vsel %vm227_vm0, %v228_v41, %v1052_v25  ;;  %vm306_vm1 = vcmp.lt.s32.totalorder %v287_v28, 1 }
  0xaf   : > { %v302_v51 = vor.u32 %v301_v42, %v300_v40  ;;  %vm309_vm2 = vcmp.lt.s32.totalorder %v287_v28, 4  ;;  %v230_v50 = vadd.s32 %v229_v44, %v225_v31  ;;  %vm308_vm3 = vcmp.lt.s32.totalorder %v287_v28, 3 }
  0xb0   : > { %v305_v52 = vor.u32 %v304_v49, %v303_v43  ;;  %v311_v53 = vsel %vm309_vm2, %v299_v48, 2102212464  ;;  %v290_v54 = vshrl.u32 %v929_v46, %v289_v29  ;;  %v314_v55 = vsel %vm306_vm1, %v293_v45, %v296_v47 }
  0xb1   : > { %v315_v57 = vsel %vm309_vm2, %v302_v51, 920167782  ;;  %v318_v58 = vsel %vm306_vm1, %v296_v47, %v299_v48  ;;  %v231_v59 = vadd.s32 536870912, %v230_v50  ;;  %vm307_vm4 = vcmp.lt.s32.totalorder %v287_v28, 2 }
  0xb2   : > { %v316_v56 = vsel %vm308_vm3, %v299_v48, %v315_v57  ;;  %v319_v60 = vsel %vm309_vm2, %v305_v52, 1326507024  ;;  %v310_v61 = vsel %vm306_vm1, %v290_v54, %v293_v45  ;;  %v312_v62 = vsel %vm308_vm3, %v296_v47, %v311_v53 }
  0xb3   : > { %v317_v63 = vsel %vm307_vm4, %v314_v55, %v316_v56  ;;  %v320_v0 = vsel %vm308_vm3, %v302_v51, %v319_v60  ;;  %v232_v1 = vshrl.u32 %v231_v59, 30  ;;  %v313_v7 = vsel %vm307_vm4, %v310_v61, %v312_v62 }
  0xb4   : > { %v321_v2 = vsel %vm307_vm4, %v318_v58, %v320_v0  ;;  %v1062_v3 = vmul.u32.u64.low %v322_v30, %v317_v63  ;;  %v1063_v4 = vmul.u32.u64.high %v322_v30, %v317_v63, %v1062_v3  ;;  %v329_v10 = vmul.u32 %v322_v30, %v313_v7  ;;  %v1078_v58 = vpop.permute.xlu1 %591 }
  0xb5   : > { %v1065_v5 = vmul.u32.u64.low %v322_v30, %v321_v2  ;;  %v1066_v6 = vmul.u32.u64.high %v322_v30, %v321_v2, %v1065_v5  ;;  %v233_v46 = vshll.u32 %v232_v1, 30  ;;  %v226_v25 = vadd.s32 %v1051_v24, %v1048_v23 }
  0xb6   : > { %v332_v9 = vadd.s32 1, %v1063_v4  ;;  %v256_v44 = vsub.s32 4, %v232_v1  ;;  %vm276_vm11 = vcmp.lt.s32.totalorder %v1030_v33, 0  ;;  %vm275_vm12 = vcmp.le.f32.partialorder %v274_v39, 0.7853982 }
  0xb7   : > { %v234_v8 = vsub.s32 %v230_v50, %v233_v46  ;;  %vm331_vm5 = vc.u32 %v1066_v6, %v1062_v3  ;;  %v330_v48 = vadd.s32 %v1062_v3, %v1066_v6  ;;  %vm262_vm3 = vweird.f32 %v1022_v26 }
  0xb8   : > { %v333_v12 = vsel %vm331_vm5, %v332_v9, %v1063_v4  ;;  %v257_v59 = vsel %vm172_vm8, %v256_v44, %v232_v1  ;;  %v1081_v0 = vpop.permute.xlu1 %594 }
  0xb9   : > { %v236_v11 = vsub.s32 0, %v234_v8  ;;  %v334_v13 = vadd.s32 %v333_v12, %v329_v10  ;;  %v259_v62 = vsel %vm171_vm10, 0, %v257_v59 }
  0xba   : > { %v263_v2 = vadd.s32 3, %v259_v62  ;;  %v471_v5 = vand.u32 3, %v259_v62 }
  0xbb   : > { %v762_v14 = vmin.u32 %v236_v11, %v234_v8  ;;  %v335_v15 = vadd.s32 536870912, %v334_v13 }
  0xbc   : > { %v264_v6 = vand.u32 3, %v263_v2  ;;  %v1087_v7 = vpop.permute.xlu1 %612  ;;  %vm476_vm14 = vcmp.eq.s32.totalorder %v471_v5, 2  ;;  %vm473_vm0 = vcmp.eq.s32.totalorder %v471_v5, 0  ;;  %vm472_vm2 = vcmp.lt.s32.totalorder %v471_v5, 2 }
  0xbd   : > { %v238_v16 = vclz %v762_v14  ;;  %v336_v17 = vshrl.u32 %v335_v15, 30 }
  0xbe   : > { %vm269_vm13 = vcmp.eq.s32.totalorder %v264_v6, 2  ;;  %vm266_vm15 = vcmp.eq.s32.totalorder %v264_v6, 0  ;;  %vm265_vm1 = vcmp.lt.s32.totalorder %v264_v6, 2 }
  0xbf   : > { %v763_v18 = vadd.s32 4294967294, %v238_v16  ;;  %v337_v19 = vshll.u32 %v336_v17, 30  ;;  %v360_v3 = vsub.s32 4, %v336_v17  ;;  %v610_v16 = vpop.permute.xlu0 %609 }
  0xc1   : > { %vm764_vm6 = vcmp.lt.s32.totalorder %v763_v18, 0  ;;  %v338_v21 = vsub.s32 %v334_v13, %v337_v19  ;;  %v361_v46 = vsel %vm276_vm11, %v360_v3, %v336_v17 }
  0xc2   : > { %v241_v20 = vsel %vm764_vm6, 0, %v763_v18  ;;  %v363_v11 = vsel %vm275_vm12, 0, %v361_v46 }
  0xc3   : > { %v242_v28 = vsub.s32 32, %v241_v20  ;;  %v246_v29 = vsub.s32 4294967266, %v241_v20  ;;  %v340_v30 = vsub.s32 0, %v338_v21  ;;  %v243_v31 = vshll.u32 %v234_v8, %v241_v20  ;;  %v630_v20 = vpop.permute.xlu1 %629 }
  0xc4   : > { %v367_v19 = vadd.s32 3, %v363_v11 }
  0xc5   : > { %v244_v32 = vshrl.u32 %v226_v25, %v242_v28  ;;  %v247_v34 = vadd.s32 127, %v246_v29  ;;  %v766_v35 = vmin.u32 %v340_v30, %v338_v21  ;;  %v574_v29 = vand.u32 3, %v363_v11 }
  0xc7   : > { %v245_v36 = vor.u32 %v244_v32, %v243_v31  ;;  %v248_v37 = vshll.u32 %v247_v34, 23  ;;  %v342_v38 = vclz %v766_v35  ;;  %v368_v31 = vand.u32 3, %v367_v19  ;;  %v1091_v34 = vpop.permute.xlu0 %632 }
  0xc8   : > { %vm575_vm4 = vcmp.lt.s32.totalorder %v574_v29, 2  ;;  %vm579_vm6 = vcmp.eq.s32.totalorder %v574_v29, 2 }
  0xc9   : > { %v249_v40 = vor.u32 4788187, %v248_v37  ;;  %v767_v41 = vadd.s32 4294967294, %v342_v38  ;;  %v252_v43 = vcvt.s32.f32 %v245_v36  ;;  %v650_v36 = vpop.permute.xlu1 %649  ;;  %vm373_vm5 = vcmp.eq.s32.totalorder %v368_v31, 2 }
  0xcb   : > { %v250_v42 = vand.u32 2147483647, %v249_v40  ;;  %vm768_vm7 = vcmp.lt.s32.totalorder %v767_v41, 0 }
  0xcc   : > { %v345_v47 = vsel %vm768_vm7, 0, %v767_v41  ;;  %vm370_vm7 = vcmp.eq.s32.totalorder %v368_v31, 0 }
  0xcd   : > { %v253_v45 = vmul.f32 %v252_v43, %v250_v42  ;;  %v346_v23 = vsub.s32 32, %v345_v47  ;;  %v350_v24 = vsub.s32 4294967266, %v345_v47  ;;  %v347_v51 = vshll.u32 %v338_v21, %v345_v47 }
  0xcf   : > { %v254_v49 = vxor.u32 2147483648, %v253_v45  ;;  %v348_v50 = vshrl.u32 %v330_v48, %v346_v23  ;;  %v351_v52 = vadd.s32 127, %v350_v24 }
  0xd1   : > { %v255_v53 = vsel %vm172_vm8, %v254_v49, %v253_v45  ;;  %v349_v55 = vor.u32 %v348_v50, %v347_v51  ;;  %v352_v57 = vshll.u32 %v351_v52, 23  ;;  %vm576_vm8 = vcmp.eq.s32.totalorder %v574_v29, 0  ;;  %v653_v50 = vpop.permute.xlu0 %652 }
  0xd2   : > { %v258_v54 = vsel %vm171_vm10, %v1022_v26, %v255_v53  ;;  %vm369_vm10 = vcmp.lt.s32.totalorder %v368_v31, 2  ;;  %v846_v53 = vpop.permute.xlu1 %845 }
  0xd3   : > { %851 = vcosq.f32 %v258_v54  ;;  %v353_v56 = vor.u32 4788187, %v352_v57  ;;  %v356_v61 = vcvt.s32.f32 %v349_v55  ;;  %v848_v11 = vunpack.i.h.bf16 %v846_v53 }
  0xd4   : > { %853 = vsinq.f32 %v258_v54 }
  0xd5   : > { %v354_v60 = vand.u32 2147483647, %v353_v56  ;;  %855 = vrcp.f32 %v1022_v26 }
  0xd7   : > { %v357_v63 = vmul.f32 %v356_v61, %v354_v60  ;;  %v847_v61 = vunpack.i.l.bf16 %v846_v53 }
  0xd9   : > { %v358_v27 = vxor.u32 2147483648, %v357_v63 }
  0xdb   : > { %v359_v4 = vsel %vm276_vm11, %v358_v27, %v357_v63  ;;  %vm366_vm11 = vweird.f32 %v1030_v33  ;;  %v674_v63 = vpop.permute.xlu0 %673 }
  0xdc   : > { %v362_v1 = vsel %vm275_vm12, %v1030_v33, %v359_v4  ;;  %vm614_vm12 = vcmp.eq.s32.totalorder %v610_v16, 1 }
  0xdd   : > { %857 = vcosq.f32 %v362_v1 }
  0xde   : > { %859 = vsinq.f32 %v362_v1 }
  0xdf   : > { %861 = vrcp.f32 %v1030_v33 }
  0xe0   : > { %v852_v8 = vpop.eup %851 }
  0xe1   : > { %v854_v9 = vpop.eup %853  ;;  %v270_v10 = vxor.u32 2147483648, %v852_v8 }
  0xe2   : > { %v267_v12 = vxor.u32 2147483648, %v854_v9  ;;  %v856_v21 = vpop.eup %855 }
  0xe3   : > { %v271_v39 = vsel %vm269_vm13, %v270_v10, %v854_v9  ;;  %v478_v13 = vsel %vm476_vm14, %v270_v10, %v854_v9  ;;  %v618_v38 = vmul.f32 3.0, %v856_v21  ;;  %v638_v26 = vmul.f32 5.0, %v856_v21 }
  0xe4   : > { %v268_v14 = vsel %vm266_vm15, %v852_v8, %v267_v12  ;;  %v475_v15 = vsel %vm473_vm0, %v852_v8, %v267_v12  ;;  %vm596_vm13 = vcmp.eq.s32.totalorder %v1078_v58, 1  ;;  %vm634_vm14 = vcmp.eq.s32.totalorder %v630_v20, 1 }
  0xe5   : > { %v272_v17 = vsel %vm265_vm1, %v268_v14, %v271_v39  ;;  %v479_v18 = vsel %vm472_vm2, %v475_v15, %v478_v13  ;;  %vm654_vm15 = vcmp.eq.s32.totalorder %v650_v36, 1  ;;  %vm597_vm0 = vcmp.eq.s32.totalorder %v1081_v0, 1  ;;  %v678_v39 = vpop.permute.xlu1 %677 }
  0xe6   : > { %v273_v25 = vsel %vm262_vm3, nan, %v272_v17  ;;  %v480_v30 = vsel %vm262_vm3, nan, %v479_v18  ;;  %vm615_vm1 = vcmp.eq.s32.totalorder %v1087_v7, 1  ;;  %vm635_vm2 = vcmp.eq.s32.totalorder %v1091_v34, 1 }
  0xe7   : > { %v584_v28 = vmul.f32 %v856_v21, %v273_v25  ;;  %vm655_vm3 = vcmp.eq.s32.totalorder %v653_v50, 1 }
  0xe9   : > { %v600_v32 = vsub.f32 %v584_v28, %v480_v30  ;;  %v598_v55 = vsel %vm596_vm13, %v584_v28, 0.0 }
  0xea   : > { %v858_v35 = vpop.eup %857 }
  0xeb   : > { %v602_v37 = vmul.f32 %v856_v21, %v600_v32  ;;  %v860_v40 = vpop.eup %859  ;;  %v374_v41 = vxor.u32 2147483648, %v858_v35 }
  0xec   : > { %v371_v42 = vxor.u32 2147483648, %v860_v40  ;;  %v862_v45 = vpop.eup %861 }
  0xed   : > { %v620_v43 = vmul.f32 %v618_v38, %v602_v37  ;;  %v375_v47 = vsel %vm373_vm5, %v374_v41, %v860_v40  ;;  %v581_v48 = vsel %vm579_vm6, %v374_v41, %v860_v40  ;;  %v616_v56 = vsel %vm614_vm12, %v602_v37, %v598_v55 }
  0xee   : > { %v372_v23 = vsel %vm370_vm7, %v858_v35, %v371_v42  ;;  %v578_v24 = vsel %vm576_vm8, %v858_v35, %v371_v42  ;;  %v619_v3 = vmul.f32 3.0, %v862_v45  ;;  %v639_v6 = vmul.f32 5.0, %v862_v45 }
  0xef   : > { %v622_v49 = vsub.f32 %v620_v43, %v584_v28  ;;  %v376_v44 = vsel %vm369_vm10, %v372_v23, %v375_v47  ;;  %v582_v51 = vsel %vm575_vm4, %v578_v24, %v581_v48 }
  0xf0   : > { %v377_v52 = vsel %vm366_vm11, nan, %v376_v44  ;;  %v583_v59 = vsel %vm366_vm11, nan, %v582_v51 }
  0xf1   : > { %v640_v54 = vmul.f32 %v638_v26, %v622_v49  ;;  %v585_v57 = vmul.f32 %v862_v45, %v377_v52  ;;  %v636_v62 = vsel %vm634_vm14, %v622_v49, %v616_v56 }
  0xf3   : > { %v642_v60 = vsub.f32 %v640_v54, %v602_v37  ;;  %v601_v33 = vsub.f32 %v585_v57, %v583_v59  ;;  %v599_v8 = vsel %vm597_vm0, %v585_v57, 0.0 }
  0xf5   : > { %v656_v27 = vsel %vm654_vm15, %v642_v60, %v636_v62  ;;  %v603_v2 = vmul.f32 %v862_v45, %v601_v33 }
  0xf6   : > { %v670_v58 = vsel %vm163_vm9, %v847_v61, %v656_v27 }
  0xf7   : > { %v680_v4 = vmul.f32 %v674_v63, %v670_v58  ;;  %v621_v1 = vmul.f32 %v619_v3, %v603_v2  ;;  %v617_v9 = vsel %vm615_vm1, %v603_v2, %v599_v8 }
  0xf9   : > { %682 = vst [vmem:[%s132_s3] sm:$0xff] %v680_v4  ;;  %v623_v5 = vsub.f32 %v621_v1, %v585_v57 }
  0xfb   : > { %v641_v46 = vmul.f32 %v639_v6, %v623_v5  ;;  %v637_v12 = vsel %vm635_vm2, %v623_v5, %v617_v9 }
  0xfd   : > { %v643_v10 = vsub.f32 %v641_v46, %v603_v2 }
  0xff   : > { %v657_v13 = vsel %vm655_vm3, %v643_v10, %v637_v12 }
 0x100   : > { %v671_v0 = vsel %vm163_vm9, %v848_v11, %v657_v13 }
 0x101   : > { %v681_v7 = vmul.f32 %v678_v39, %v671_v0 }
 0x103   : > { %683 = vst [vmem:[%s132_s3 + $0x8] sm:$0xff] %v681_v7 }
 0x104   : > { %876 = shalt.err (!%p873_p3)
}
 0x105   : > { %s877_s22 = scalar_lea.hbm %s1112_s8, 256  ;;  %s881_s25 = scalar_lea.hbm %s1158_s2, 512 }
 0x106   : > { %p878_p4 = scmp.ne.s32.totalorder %s1112_s8, %s877_s22  ;;  %p882_p9 = scmp.lt.s32.totalorder %s1112_s8, %s1158_s2 }
 0x107   : > { %p883_p10 = scmp.lt.s32.totalorder %s881_s25, %s877_s22 }
 0x108   : > { %p879_p7 = pnand %p878_p4, %p992_p5 }
 0x109   : > { %p884_p11 = por %p883_p10, %p882_p9 }
 0x10a   : > { %p880_p8 = pneg %p879_p7 }
 0x10c   : > { %p885_p12 = pnand %p884_p11, %p880_p8 }
 0x10e   : > { %888 = shalt.err (!%p885_p12)
}
 0x10f   : > { %s936_s28 = smov 128   ;;  %s937_s29 = smov 256  }
 0x110   : > { %s938_s30 = smov 8  }
 0x111   : > { %789 = dma.vmem_to_hbm [thread:$0]  (%p992_p5), %s1105_s4, 256, %s1112_s8, %s1116_s13, %s936_s28, %s937_s29, %s938_s30  }
 0x112 PF: > { %p795_p13 = scmp.ge.s32.totalorder %s923_s12, 2  ;;  %s712_s3 = sand.u32 1, %s911_s9  }
 0x113   : > { %s713_s5 = scalar_lea.sflag [#allocation3], %s712_s3 }
 0x114   : > { %p792_p0 = pnand %p795_p13, %p996_p6 }
 0x116   : > { %p793_p1 = pneg %p792_p0 }
 0x118   : > { %906 = dma.done.wait (%p793_p1), %s713_s5, 256  }
 0x119   : > { %908 = vsyncadd (%p793_p1), %s713_s5, 4294967040  ;;  %p12_p2 = scmp.ge.s32.totalorder %s979_s15, 4   ;;  %s1161_s9 = smov %s915_s10 }
 0x11a   : > { %s1162_s10 = smov %s919_s11  ;;  %s1163_s11 = smov %s990_s18 }
 0x11b   : > { %s1164_s12 = smov %s979_s15  ;;  %14 = sbr.rel (!%p12_p2) target bundleno = 3 (0x3), region = 63 }
 0x120   :  { %718 = vsyncpa [#allocation3], 1 }
 0x121   :  { %720 = vsyncpa [#allocation3 + $0x1], 1 }

</bundles_post_ra>
